<compile_context>
chip_gen: v7x
topology: tpu7x:2x2x1
jax: 0.10.0
libtpu: 0.0.40
codegen_flags: <defaults>
</compile_context>

<pallas_src>
import functools

import numpy as np
import jax
import jax.numpy as jnp
from jax.experimental import pallas as pl
from jax.experimental.pallas import tpu as pltpu

_LANE = 128        # TPU lane width: sub-blocks are reversed 128 lanes at a time
_ROW_GRAN = 32     # row-tile granularity legal for f32 (8) / bf16 (16) / int8 (32)


# ---------------------------------------------------------------------------
# One-time probe of pltpu.roll's rotate direction (cached in a Python global).
# ---------------------------------------------------------------------------
_ROLL_NP_SEMANTICS = None


def _roll_is_numpy_semantics():
    """True iff pltpu.roll(x, s, axis)[..., i] == x[..., (i - s) % n]."""
    global _ROLL_NP_SEMANTICS
    if _ROLL_NP_SEMANTICS is None:
        def probe(x_ref, o_ref):
            o_ref[...] = pltpu.roll(x_ref[...], 1, axis=1)

        x = jnp.tile(jax.lax.iota(jnp.float32, _LANE)[None, :], (8, 1))
        y = pl.pallas_call(
            probe, out_shape=jax.ShapeDtypeStruct((8, _LANE), jnp.float32)
        )(x)
        try:
            _ROLL_NP_SEMANTICS = bool(np.asarray(y)[0, 1] == 0.0)
        except Exception:          # called under a trace: assume np.roll, don't cache
            return True
    return _ROLL_NP_SEMANTICS


# ---------------------------------------------------------------------------
# In-kernel lane reversal: 7-stage XLU butterfly, out[i] = in[127 - i].
# ---------------------------------------------------------------------------
def _reverse_lanes_128(blk, lane_idx, roll_np):
    for b in (64, 32, 16, 8, 4, 2, 1):
        if roll_np:                            # np.roll: out[i] = x[(i - shift) % n]
            s_fwd, s_bwd = _LANE - b, b
        else:                                  # opposite rotate convention
            s_fwd, s_bwd = b, _LANE - b
        fwd = pltpu.roll(blk, s_fwd, axis=1)   # x[(i + b) % 128]
        bwd = pltpu.roll(blk, s_bwd, axis=1)   # x[(i - b) % 128]
        blk = jnp.where((lane_idx & b) == 0, fwd, bwd)   # out[i] = in[i ^ b]
    return blk


@functools.lru_cache(maxsize=None)
def _make_hflip_kernel(nw, work_dtype_name, roll_np):
    work_dtype = np.dtype(work_dtype_name)

    def kernel(x_ref, o_ref):
        rows = x_ref.shape[0]
        lane = jax.lax.broadcasted_iota(jnp.int32, (rows, _LANE), 1)
        # Reverse each 128-lane sub-block; sub-block ORDER reversal is free
        # (static mirrored store offsets); stores are lane-dense full vregs.
        for k in range(nw):
            blk = x_ref[:, k * _LANE:(k + 1) * _LANE].astype(work_dtype)
            blk = _reverse_lanes_128(blk, lane, roll_np)
            lo = (nw - 1 - k) * _LANE
            o_ref[:, lo:lo + _LANE] = blk.astype(o_ref.dtype)

    return kernel


def _pick_row_tile(n_rows, row_bytes, block_budget_bytes):
    """Rows per grid step: as fat as the VMEM budget allows (in + out blocks,
    double-buffered); split into >=2 steps when possible (v7x megacore)."""
    g = _ROW_GRAN
    max_tr = max(g, (block_budget_bytes // (4 * row_bytes)) // g * g)
    if n_rows <= max_tr:
        if n_rows >= 2 * g:
            half = (((n_rows + 1) // 2) + g - 1) // g * g
            if half < n_rows:
                return int(half)
        return int(n_rows)
    return int(max_tr)


def _hflip_image(img):
    """Reverse the last (W) axis of a (C, H, W) image with a Pallas TPU kernel."""
    C, H, W = img.shape
    R = C * H
    Wp = ((W + _LANE - 1) // _LANE) * _LANE
    pad = Wp - W
    nw = Wp // _LANE

    img2d = img.reshape(R, W)                  # layout no-op: W stays on the lanes
    if pad:
        # Pad on the right; after the flip the valid pixels occupy the trailing
        # W columns, so drop the leading `pad` columns afterwards.
        img2d = jnp.pad(img2d, ((0, 0), (0, pad)))

    # HBM/VMEM traffic stays in the native dtype; only in-kernel compute is
    # widened to a 32-bit type (guaranteed roll/select support, incl. uint8).
    if jnp.issubdtype(img.dtype, jnp.floating):
        work_dtype = jnp.float32
    else:
        work_dtype = jnp.int32

    itemsize = np.dtype(img.dtype).itemsize
    try:
        vmem_cap = pltpu.get_tpu_info().vmem_capacity_bytes
    except Exception:
        vmem_cap = 64 * 1024 * 1024            # conservative default (v7x per-TC)
    vmem_limit = int(min((vmem_cap * 3) // 4, 96 * 1024 * 1024))
    # Half the limit for the pipelined image blocks, half for in-kernel temps.
    tr = _pick_row_tile(R, Wp * itemsize, vmem_limit // 2)
    ni = pl.cdiv(R, tr)

    kernel = _make_hflip_kernel(nw, np.dtype(work_dtype).name,
                                _roll_is_numpy_semantics())

    out2d = pl.pallas_call(
        kernel,
        out_shape=jax.ShapeDtypeStruct((R, Wp), img.dtype),
        grid=(ni,),
        in_specs=[pl.BlockSpec((tr, Wp), lambda i: (i, 0))],
        out_specs=pl.BlockSpec((tr, Wp), lambda i: (i, 0)),
        compiler_params=pltpu.CompilerParams(
            dimension_semantics=("parallel",),
            vmem_limit_bytes=vmem_limit,
        ),
        cost_estimate=pl.CostEstimate(
            flops=0, transcendentals=0,
            bytes_accessed=2 * R * Wp * itemsize),
    )(img2d)

    if pad:
        out2d = out2d[:, pad:]
    return out2d.reshape(C, H, W)


# ---------------------------------------------------------------------------
# Plain-JAX bbox flip (lane-sparse (N, 4): kept out of the kernel on purpose).
# ---------------------------------------------------------------------------
def _hflip_box(box, x_bound):
    assert box.ndim == 2 and box.shape[1] == 4, (
        "horizontal flip expects (N, 4) boxes of (x, y, width, height)")
    reducer = jnp.zeros_like(box).at[:, 0].set(x_bound - box[:, 2])
    return jnp.abs(box - reducer)


# ---------------------------------------------------------------------------
# Wrapper: matches custom_RandomHorizontalFlip.forward semantics.
# ---------------------------------------------------------------------------
def custom_random_horizontal_flip(img, bbox, key, p=0.5):
    """Returns (img_out, bbox_out, flipped_flag)."""
    C, H, W = img.shape
    _roll_is_numpy_semantics()                 # probe eagerly, outside lax.cond
    flipped = jax.random.uniform(key, ()) < p  # scalar Bernoulli(p) flip decision

    if bbox is None:
        img_out = jax.lax.cond(flipped, _hflip_image, lambda x: x, img)
        return img_out, None, flipped

    def _flip(ops):
        im, box = ops
        return _hflip_image(im), _hflip_box(box, W)

    img_out, bbox_out = jax.lax.cond(flipped, _flip, lambda ops: ops, (img, bbox))
    return img_out, bbox_out, flipped


# ---------------------------------------------------------------------------
# Reference + demo
# ---------------------------------------------------------------------------
def _reference_flip(img, bbox, w):
    img_f = np.asarray(img)[..., ::-1]
    if bbox is None:
        return img_f, None
    box = np.asarray(bbox)
    reducer = np.zeros_like(box)
    reducer[:, 0] = w - box[:, 2]
    return img_f, np.abs(box - reducer)


if __name__ == "__main__":
    root = jax.random.PRNGKey(0)
    k_img, k_box, k_flip, k_img2, k_box2, k_img3 = jax.random.split(root, 6)

    # Case 1: W=16 (padded to one 128-lane block), forced flip (p=1.0).
    C, H, W = 4, 16, 16
    N = 8
    img = jax.random.normal(k_img, (C, H, W), dtype=jnp.float32)
    bbox = jax.random.uniform(k_box, (N, 4), dtype=jnp.float32) * W

    img_f, bbox_f, flag = custom_random_horizontal_flip(img, bbox, k_flip, p=1.0)
    jax.block_until_ready((img_f, bbox_f, flag))
    assert bool(flag)
    ref_img, ref_box = _reference_flip(img, bbox, W)
    np.testing.assert_array_equal(np.asarray(img_f), ref_img)  # exact: pure data movement
    np.testing.assert_allclose(np.asarray(bbox_f), ref_box, rtol=1e-6, atol=1e-6)

    # Case 2: same inputs, forced no-flip (p=0.0) -> pass-through.
    img_n, bbox_n, flag_n = custom_random_horizontal_flip(img, bbox, k_flip, p=0.0)
    jax.block_until_ready((img_n, bbox_n, flag_n))
    assert not bool(flag_n)
    np.testing.assert_array_equal(np.asarray(img_n), np.asarray(img))
    np.testing.assert_array_equal(np.asarray(bbox_n), np.asarray(bbox))

    # Case 3: lane-dense width (W = 640 = 5 * 128): multiple mirrored sub-blocks.
    C2, H2, W2 = 2, 8, 640
    img2 = jax.random.normal(k_img2, (C2, H2, W2), dtype=jnp.float32)
    bbox2 = jax.random.uniform(k_box2, (N, 4), dtype=jnp.float32) * W2
    img2_f, bbox2_f, flag2 = custom_random_horizontal_flip(img2, bbox2, k_flip, p=1.0)
    jax.block_until_ready((img2_f, bbox2_f))
    assert bool(flag2)
    ref_img2, ref_box2 = _reference_flip(img2, bbox2, W2)
    np.testing.assert_array_equal(np.asarray(img2_f), ref_img2)
    np.testing.assert_allclose(np.asarray(bbox2_f), ref_box2, rtol=1e-6, atol=1e-6)

    # Case 4: native uint8 image, odd width (padded to 256), bbox=None.
    C3, H3, W3 = 3, 16, 130
    img3 = jax.random.randint(k_img3, (C3, H3, W3), 0, 256,
                              dtype=jnp.int32).astype(jnp.uint8)
    img3_f, bbox3_f, flag3 = custom_random_horizontal_flip(img3, None, k_flip, p=1.0)
    jax.block_until_ready(img3_f)
    assert bool(flag3) and bbox3_f is None
    np.testing.assert_array_equal(np.asarray(img3_f), np.asarray(img3)[..., ::-1])

    print("KERNEL_OK")
</pallas_src>

<mosaic_0001>
module attributes {stable_mosaic.version = 11 : i64} {
  func.func @probe(%arg0: memref<8x128xf32, #tpu.memory_space<vmem>>, %arg1: memref<8x128xf32, #tpu.memory_space<vmem>>) attributes {dimension_semantics = [], scalar_prefetch = 0 : i64, scratch_operands = 0 : i64, tpu.core_type = #tpu.core_type<tc>} {
    %c0 = arith.constant 0 : index
    %c0_0 = arith.constant 0 : index
    %0 = vector.load %arg0[%c0, %c0_0] : memref<8x128xf32, #tpu.memory_space<vmem>>, vector<8x128xf32>
    %c1_i32 = arith.constant 1 : i32
    %1 = tpu.dynamic_rotate %0 by %c1_i32 dim 1 : vector<8x128xf32>, i32 -> vector<8x128xf32>
    %c0_1 = arith.constant 0 : index
    %c0_2 = arith.constant 0 : index
    %2 = vector.load %arg1[%c0_1, %c0_2] : memref<8x128xf32, #tpu.memory_space<vmem>>, vector<8x128xf32>
    tpu.vector_store %arg1[%c0_1, %c0_2], %1 {strides = array<i32>} : memref<8x128xf32, #tpu.memory_space<vmem>>, vector<8x128xf32>,
    return
  }
}

</mosaic_0001>

<bundles_post_ra>
// kernel: tpu_custom_call.1
= control target key start
LH: loop header
LB: loop body
LE: loop exit
PB: predicated region body
PF: predicated region fallthrough
CT: control target
= control target key end

     0   :  { %6 = vsyncpa [#allocation3], 0  ;;  %s128_s0 = inlined_call_operand.hbm [shape: f32[8,128], index: 0, kind: input, shape index: {}]   ;;  %s129_s1 = inlined_call_operand.hbm [shape: f32[8,128], index: 1, kind: output, shape index: {}]  }
   0x1   :  { %7 = vsyncpa [#allocation4], 0  ;;  %s91_s6 = smov [#allocation2]   ;;  %s43_s10 = scalar_lea.hbm %s128_s0, 128 }
   0x2   :  { %s14_s7 = sshll.u32 %s91_s6, 4  ;;  %p44_p0 = scmp.ne.s32.totalorder %s128_s0, %s43_s10  ;;  %s15_s7 = int_to_ptr.vmem [resolvable:$true] %s14_s7 }
   0x3   :  { %p47_p1 = scmp.lt.u32.totalorder %s43_s10, %s128_s0 }
   0x5   :  { %p49_p2 = pnand %p47_p1, %p44_p0 }
   0x7   :  { %52 = shalt.err (!%p49_p2)
}
   0x8   :  { %s53_s15 = scalar_lea.vmem %s15_s7, 128  ;;  %p58_p4 = scmp.lt.s32.totalorder %s15_s7, %s15_s7 }
   0x9   :  { %p54_p3 = scmp.ne.s32.totalorder %s15_s7, %s53_s15  ;;  %p59_p5 = scmp.lt.s32.totalorder %s53_s15, %s53_s15 }
   0xb   :  { %p60_p6 = por %p59_p5, %p58_p4 }
   0xd   :  { %p61_p7 = pnand %p60_p6, %p54_p3 }
   0xf   :  { %64 = shalt.err (!%p61_p7)
}
  0x10   :  { %17 = dma.hbm_to_vmem [thread:$0]  %s128_s0, 128, %s15_s7, [#allocation3]  }
  0x11   :  { %87 = dma.done.wait [#allocation3], 128  }
  0x12   :  { %88 = vsyncadd [#allocation3], 4294967168  ;;  %v21_v0 = vld [vmem:[#allocation2] sm:$0xff]  ;;  %s92_s18 = smov 1   ;;  %s93_s19 = smov [#allocation5]  }
  0x13   :  { %22 = vrot.lane.b32.xlu0 %v21_v0, %s92_s18  ;;  %s31_s20 = sshll.u32 %s93_s19, 4  ;;  %s32_s20 = int_to_ptr.vmem [resolvable:$true] %s31_s20 }
  0x14   :  { %s65_s21 = scalar_lea.vmem %s32_s20, 128  ;;  %p70_p9 = scmp.lt.s32.totalorder %s32_s20, %s32_s20 }
  0x15   :  { %p66_p8 = scmp.ne.s32.totalorder %s32_s20, %s65_s21  ;;  %p71_p10 = scmp.lt.s32.totalorder %s65_s21, %s65_s21 }
  0x17   :  { %p72_p11 = por %p71_p10, %p70_p9 }
  0x19   :  { %p73_p12 = pnand %p72_p11, %p66_p8 }
  0x85   :  { %v23_v1 = vpop.permute.xlu0 %22 }
  0x86   :  { %24 = vst [vmem:[#allocation5] sm:$0xff] %v23_v1 }
  0x87   :  { %76 = shalt.err (!%p73_p12)
}
  0x88   :  { %s77_s0 = scalar_lea.hbm %s129_s1, 128 }
  0x89   :  { %p78_p13 = scmp.ne.s32.totalorder %s129_s1, %s77_s0  ;;  %p81_p0 = scmp.lt.u32.totalorder %s77_s0, %s129_s1 }
  0x8b   :  { %p83_p1 = pnand %p81_p0, %p78_p13 }
  0x8d   :  { %86 = shalt.err (!%p83_p1)
}
  0x8e   :  { %34 = dma.vmem_to_hbm [thread:$0]  %s32_s20, 128, %s129_s1, [#allocation4]  }
  0x8f   :  { %89 = dma.done.wait [#allocation4], 128  }
  0x90   :  { %90 = vsyncadd [#allocation4], 4294967168 }
  0x91   :  { %38 = vsyncpa [#allocation3], 1 }
  0x92   :  { %39 = vsyncpa [#allocation4], 1 }

</bundles_post_ra>
